<compile_context>
chip_gen: v7x
topology: tpu7x:2x2x1
jax: 0.10.0
libtpu: 0.0.40
codegen_flags: <defaults>
</compile_context>

<pallas_src>
import functools

import numpy as np
import jax
import jax.numpy as jnp
from jax.experimental import pallas as pl
from jax.experimental.pallas import tpu as pltpu


# ---------------- parameter construction (glue, plain numpy/JAX) -------------

def dct_mat(size):
    m = [[(np.sqrt(1.0 / size) if i == 0 else np.sqrt(2.0 / size))
          * np.cos((j + 0.5) * np.pi * i / size)
          for j in range(size)] for i in range(size)]
    return np.asarray(m, dtype=np.float32)


def generate_filter(start, end, size):
    return np.asarray(
        [[0.0 if (i + j > end or i + j < start) else 1.0 for j in range(size)]
         for i in range(size)], dtype=np.float32)


def build_fad_params(size, key):
    """Deterministic synthetic parameters mirroring FAD_Head.__init__."""
    dct = jnp.asarray(dct_mat(size))          # (S, S) = D
    dct_t = dct.T                             # (S, S) = D^T

    # (band_start, band_end) for low / middle / high / all, exactly as in torch
    bands = [
        (0.0, size // 2.82),
        (size // 2.82, size // 2),
        (size // 2, size * 2),
        (0.0, size * 2),
    ]
    keys = jax.random.split(key, 4)
    filters = []
    for (start, end), k in zip(bands, keys):
        base = jnp.asarray(generate_filter(start, end, size))        # frozen
        learnable = 0.1 * jax.random.normal(k, (size, size), jnp.float32)
        # norm_sigma(x) = 2*sigmoid(x) - 1
        filt = base + (2.0 * jax.nn.sigmoid(learnable) - 1.0)
        filters.append(filt)
    filters = jnp.stack(filters, axis=0)       # (4, S, S)
    return dct, dct_t, filters


def _cdiv(a, b):
    return -(-a // b)


# ---------- fused transform (once per parameter update, not per call) --------

def build_fused_matrix(dct, dct_t, filters):
    """Fold 2-D DCT, the 4 band filters and the inverse 2-D DCT into one
    (S*S, 4*S*S) matrix using the row-major vec identities:
        vec_r(D X D^T)   = vec_r(X) @ K_fwd,   K_fwd = kron(D, D).T
        vec_r(D^T P D)   = vec_r(P) @ K_inv,   K_inv = kron(D^T, D^T).T
        vec_r(band_f(X)) = vec_r(X) @ M_f,     M_f = (K_fwd * vec(filt_f)) @ K_inv
    Columns are band-major: [M_0 | M_1 | M_2 | M_3]."""
    size = dct.shape[0]
    ss = size * size
    k_fwd = jnp.kron(dct, dct).T          # (SS, SS)
    k_inv = jnp.kron(dct_t, dct_t).T      # (SS, SS)
    filt_flat = filters.reshape(4, ss)    # (4, SS)
    m_bands = [(k_fwd * filt_flat[f][None, :]) @ k_inv for f in range(4)]
    return jnp.concatenate(m_bands, axis=1)   # (SS, 4*SS), float32


# ------------------------------ Pallas kernel --------------------------------

def fad_kernel(x_ref, m_ref, o_ref):
    # x_ref : (TB, C, SS)     compute-dtype input planes (row-major flattened)
    # m_ref : (SS, 4*SS)      fused per-band transform, band-major columns
    # o_ref : (TB, 4, C, SS)  float32 output == torch.cat(dim=1) layout
    tb, c, ss = x_ref.shape
    m = m_ref[...]                         # hoisted: loaded once per grid step

    def one_batch_row(b):
        # (C, SS) @ (SS, 4*SS): a single MXU matmul covering all 4 bands.
        y = jnp.dot(x_ref[b], m, preferred_element_type=jnp.float32)
        for f in range(4):                 # static, lane-dense slices of width SS
            o_ref[b, f] = y[:, f * ss:(f + 1) * ss].astype(o_ref.dtype)

    if tb <= 8:                            # small block: static unroll
        for b in range(tb):
            one_batch_row(b)
    else:                                  # large block: in-kernel loop
        def loop_body(b, carry):
            one_batch_row(b)
            return carry
        jax.lax.fori_loop(0, tb, loop_body, 0)


def fad_head_forward(x, m_fused, *, max_tile_planes=512,
                     compute_dtype=jnp.bfloat16):
    """x: (B, C, S, S) float32, m_fused: (S*S, 4*S*S) -> (B, 4*C, S, S)."""
    B, C, S, _ = x.shape
    SS = S * S
    assert SS % 128 == 0, (
        f"Kronecker FAD kernel requires S*S % 128 == 0 (got S={S}); use a "
        "separable/tiled D @ X @ D^T variant for other sizes.")
    assert m_fused.shape == (SS, 4 * SS), m_fused.shape

    x_flat = x.reshape(B, C, SS).astype(compute_dtype)
    m = m_fused.astype(compute_dtype)

    # ---- tile selection (review items: minimal padding + >=2 grid steps) ----
    tb_budget = max(1, max_tile_planes // C)          # batch rows per step budget
    num_tiles = max(_cdiv(B, tb_budget), 2 if B >= 2 else 1)
    TB = _cdiv(B, num_tiles)                          # batch rows per grid step
    grid_b = _cdiv(B, TB)
    B_pad = grid_b * TB                               # padding < TB batch rows
    if B_pad != B:
        x_flat = jnp.pad(x_flat, ((0, B_pad - B), (0, 0), (0, 0)))

    out = pl.pallas_call(
        fad_kernel,
        out_shape=jax.ShapeDtypeStruct((B_pad, 4, C, SS), x.dtype),
        grid=(grid_b,),
        in_specs=[
            pl.BlockSpec((TB, C, SS), lambda i: (i, 0, 0)),
            pl.BlockSpec((SS, 4 * SS), lambda i: (0, 0)),    # grid-invariant
        ],
        out_specs=pl.BlockSpec((TB, 4, C, SS), lambda i: (i, 0, 0, 0)),
        compiler_params=pltpu.CompilerParams(
            dimension_semantics=("parallel",),
            vmem_limit_bytes=32 * 1024 * 1024),
    )(x_flat, m)

    out = out[:B]                                      # drop batch padding
    # (B, 4, C, SS) is already band-major == torch.cat(dim=1): free reshape.
    return out.reshape(B, 4 * C, S, S)


# jit the whole wrapper (pad/slice/reshape fuse around the pallas_call).
fad_head_forward_bf16 = jax.jit(
    functools.partial(fad_head_forward, compute_dtype=jnp.bfloat16))
fad_head_forward_f32 = jax.jit(
    functools.partial(fad_head_forward, compute_dtype=jnp.float32))


# --------------------------- reference (plain JAX) ----------------------------

def fad_head_reference(x, dct, dct_t, filters):
    x_freq = jnp.einsum("ij,bcjk,kl->bcil", dct, x, dct_t)
    ys = []
    for f in range(4):
        x_pass = x_freq * filters[f]
        y = jnp.einsum("ij,bcjk,kl->bcil", dct_t, x_pass, dct)
        ys.append(y)
    return jnp.concatenate(ys, axis=1)


# ----------------------------------- main -------------------------------------

if __name__ == "__main__":
    size = 16           # spatial size S (FAD_Head(size))
    B, C = 2, 4

    key = jax.random.PRNGKey(0)
    k_param, k_x = jax.random.split(key)

    dct, dct_t, filters = build_fad_params(size, k_param)
    x = jax.random.normal(k_x, (B, C, size, size), jnp.float32)

    # Fused (SS, 4*SS) transform — computed once per parameter update.
    m_fused = build_fused_matrix(dct, dct_t, filters)

    ref = fad_head_reference(x, dct, dct_t, filters)

    # float32 compute path: tight validation of the fused-Kronecker math.
    out_f32 = jax.block_until_ready(fad_head_forward_f32(x, m_fused))
    assert out_f32.shape == (B, 4 * C, size, size), out_f32.shape
    np.testing.assert_allclose(np.asarray(out_f32), np.asarray(ref),
                               rtol=1e-4, atol=1e-4)

    # bfloat16 compute path (default / MXU-native): relative-Frobenius check.
    out_bf16 = jax.block_until_ready(fad_head_forward_bf16(x, m_fused))
    assert out_bf16.shape == (B, 4 * C, size, size), out_bf16.shape
    ref_np = np.asarray(ref, dtype=np.float64)
    err = np.linalg.norm(np.asarray(out_bf16, dtype=np.float64) - ref_np)
    rel_err = err / np.linalg.norm(ref_np)
    assert rel_err < 5e-2, f"bf16 path relative error too large: {rel_err}"

    print("KERNEL_OK")
</pallas_src>

<mosaic_0001>
module attributes {stable_mosaic.version = 11 : i64} {
  func.func @fad_kernel(%arg0: i32, %arg1: memref<1x4x256xf32, #tpu.memory_space<vmem>>, %arg2: memref<256x1024xf32, #tpu.memory_space<vmem>>, %arg3: memref<1x4x4x256xf32, #tpu.memory_space<vmem>>) attributes {dimension_semantics = [#tpu.dimension_semantics<parallel>], iteration_bounds = array<i64: 2>, scalar_prefetch = 0 : i64, scratch_operands = 0 : i64, tpu.core_type = #tpu.core_type<tc>, window_params = [{transform_indices = @transform_0, window_bounds = array<i64: 1, 4, 256>}, {pipeline_mode = #tpu.pipeline_mode<synchronous>, transform_indices = @transform_1, window_bounds = array<i64: 256, 1024>}, {transform_indices = @transform_2, window_bounds = array<i64: 1, 4, 4, 256>}]} {
    %c0 = arith.constant 0 : index
    %c0_0 = arith.constant 0 : index
    %0 = vector.load %arg2[%c0, %c0_0] : memref<256x1024xf32, #tpu.memory_space<vmem>>, vector<256x1024xf32>
    %c0_1 = arith.constant 0 : index
    %c0_2 = arith.constant 0 : index
    %c0_3 = arith.constant 0 : index
    %1 = vector.load %arg1[%c0_1, %c0_2, %c0_3] : memref<1x4x256xf32, #tpu.memory_space<vmem>>, vector<1x4x256xf32>
    %2 = vector.shape_cast %1 : vector<1x4x256xf32> to vector<4x256xf32>
    %cst = arith.constant dense<0.000000e+00> : vector<4x1024xf32>
    %3 = tpu.matmul %2, %0, %cst {dimension_numbers = #tpu.dot_dimension_numbers<[1], [0], [0], [1], [0, 0, 1, 1], [], []>} : vector<4x256xf32>, vector<256x1024xf32>, vector<4x1024xf32> -> vector<4x1024xf32>
    %4 = vector.extract_strided_slice %3 {offsets = [0, 0], sizes = [4, 256], strides = [1, 1]} : vector<4x1024xf32> to vector<4x256xf32>
    %c0_4 = arith.constant 0 : index
    %c0_5 = arith.constant 0 : index
    %c0_6 = arith.constant 0 : index
    %c0_7 = arith.constant 0 : index
    %5 = vector.load %arg3[%c0_4, %c0_5, %c0_6, %c0_7] : memref<1x4x4x256xf32, #tpu.memory_space<vmem>>, vector<1x1x4x256xf32>
    %6 = vector.shape_cast %5 : vector<1x1x4x256xf32> to vector<4x256xf32>
    %7 = vector.shape_cast %4 : vector<4x256xf32> to vector<1x1x4x256xf32>
    tpu.vector_store %arg3[%c0_4, %c0_5, %c0_6, %c0_7], %7 {strides = array<i32>} : memref<1x4x4x256xf32, #tpu.memory_space<vmem>>, vector<1x1x4x256xf32>,
    %8 = vector.extract_strided_slice %3 {offsets = [0, 256], sizes = [4, 256], strides = [1, 1]} : vector<4x1024xf32> to vector<4x256xf32>
    %c0_8 = arith.constant 0 : index
    %c1 = arith.constant 1 : index
    %c0_9 = arith.constant 0 : index
    %c0_10 = arith.constant 0 : index
    %9 = vector.load %arg3[%c0_8, %c1, %c0_9, %c0_10] : memref<1x4x4x256xf32, #tpu.memory_space<vmem>>, vector<1x1x4x256xf32>
    %10 = vector.shape_cast %9 : vector<1x1x4x256xf32> to vector<4x256xf32>
    %11 = vector.shape_cast %8 : vector<4x256xf32> to vector<1x1x4x256xf32>
    tpu.vector_store %arg3[%c0_8, %c1, %c0_9, %c0_10], %11 {strides = array<i32>} : memref<1x4x4x256xf32, #tpu.memory_space<vmem>>, vector<1x1x4x256xf32>,
    %12 = vector.extract_strided_slice %3 {offsets = [0, 512], sizes = [4, 256], strides = [1, 1]} : vector<4x1024xf32> to vector<4x256xf32>
    %c0_11 = arith.constant 0 : index
    %c2 = arith.constant 2 : index
    %c0_12 = arith.constant 0 : index
    %c0_13 = arith.constant 0 : index
    %13 = vector.load %arg3[%c0_11, %c2, %c0_12, %c0_13] : memref<1x4x4x256xf32, #tpu.memory_space<vmem>>, vector<1x1x4x256xf32>
    %14 = vector.shape_cast %13 : vector<1x1x4x256xf32> to vector<4x256xf32>
    %15 = vector.shape_cast %12 : vector<4x256xf32> to vector<1x1x4x256xf32>
    tpu.vector_store %arg3[%c0_11, %c2, %c0_12, %c0_13], %15 {strides = array<i32>} : memref<1x4x4x256xf32, #tpu.memory_space<vmem>>, vector<1x1x4x256xf32>,
    %16 = vector.extract_strided_slice %3 {offsets = [0, 768], sizes = [4, 256], strides = [1, 1]} : vector<4x1024xf32> to vector<4x256xf32>
    %c0_14 = arith.constant 0 : index
    %c3 = arith.constant 3 : index
    %c0_15 = arith.constant 0 : index
    %c0_16 = arith.constant 0 : index
    %17 = vector.load %arg3[%c0_14, %c3, %c0_15, %c0_16] : memref<1x4x4x256xf32, #tpu.memory_space<vmem>>, vector<1x1x4x256xf32>
    %18 = vector.shape_cast %17 : vector<1x1x4x256xf32> to vector<4x256xf32>
    %19 = vector.shape_cast %16 : vector<4x256xf32> to vector<1x1x4x256xf32>
    tpu.vector_store %arg3[%c0_14, %c3, %c0_15, %c0_16], %19 {strides = array<i32>} : memref<1x4x4x256xf32, #tpu.memory_space<vmem>>, vector<1x1x4x256xf32>,
    return
  }
  func.func @transform_0(%arg0: i32) -> (i32, i32, i32) {
    %c0_i32 = arith.constant 0 : i32
    %c0_i32_0 = arith.constant 0 : i32
    %c0_i32_1 = arith.constant 0 : i32
    return %arg0, %c0_i32, %c0_i32_0 : i32, i32, i32
  }
  func.func @transform_1(%arg0: i32) -> (i32, i32) {
    %c0_i32 = arith.constant 0 : i32
    %c0_i32_0 = arith.constant 0 : i32
    %c0_i32_1 = arith.constant 0 : i32
    return %c0_i32, %c0_i32_0 : i32, i32
  }
  func.func @transform_2(%arg0: i32) -> (i32, i32, i32, i32) {
    %c0_i32 = arith.constant 0 : i32
    %c0_i32_0 = arith.constant 0 : i32
    %c0_i32_1 = arith.constant 0 : i32
    %c0_i32_2 = arith.constant 0 : i32
    return %arg0, %c0_i32, %c0_i32_0, %c0_i32_1 : i32, i32, i32, i32
  }
}

</mosaic_0001>

<bundles_post_ra>
// kernel: fad_head_forward.1
= control target key start
LH: loop header
LB: loop body
LE: loop exit
PB: predicated region body
PF: predicated region fallthrough
CT: control target
= control target key end

     0   :  { %7 = vsyncpa [#allocation3], 0  ;;  %s1147_s9 = smov 0   ;;  %s1223_s0 = inlined_call_operand.vmem [shape: f32[2,4,256], index: 0, kind: input, shape index: {}]   ;;  %s1224_s1 = inlined_call_operand.hbm [shape: f32[256,1024], index: 1, kind: input, shape index: {}]   ;;  %s1225_s2 = inlined_call_operand.vmem [shape: f32[2,4,4,256], index: 2, kind: output, shape index: {}]  }
   0x1 LB: > { %s1153_s10 = sadd.s32 4294967295, %s1127_s9   ;;  %p795_p0 = scmp.ge.s32.totalorder %s1127_s9, 1  ;;  %s1127_s9 = sphi %s1147_s9, %s13_s9  }
   0x2   : > { %p91_p1 = scmp.lt.s32.totalorder %s1127_s9, 3  ;;  %s1129_s11 = smov [#allocation2]  }
   0x3   : > { %s103_s12 = sshll.u32 %s1129_s11, 4  ;;  %p1226_p3 = scmp.eq.s32.totalorder %s1153_s10, 0  ;;  %s104_s12 = int_to_ptr.vmem [resolvable:$true] %s103_s12 }
   0x4   : > { %p1157_p2 = pnand %p795_p0, %p91_p1  ;;  %s1089_s17 = scalar_lea.hbm %s1224_s1, 32768 }
   0x5   : > { %p1090_p6 = scmp.ne.s32.totalorder %s1224_s1, %s1089_s17  ;;  %p1096_p10 = scmp.lt.u32.totalorder %s1089_s17, %s1224_s1 }
   0x6   : > { %s1228_s13 = scalar_select %p1157_p2, 1, 0 }
   0x7   : > { %p1071_p4 = pneg %p1157_p2 }
   0x9   : > { %p1166_p5 = pnand %p1226_p3, %p1071_p4 }
   0xb   : > { %p1091_p7 = pneg %p1166_p5 }
   0xd   : > { %p1092_p8 = pnand %p1091_p7, %p1090_p6 }
   0xf   : > { %p1093_p9 = pneg %p1092_p8 }
  0x11   : > { %p1098_p11 = pnand %p1096_p10, %p1093_p9 }
  0x13   : > { %1101 = shalt.err (!%p1098_p11)
}
  0x14   : > { %s1102_s22 = scalar_lea.vmem %s104_s12, 32768  ;;  %p1110_p1 = scmp.lt.s32.totalorder %s104_s12, %s104_s12 }
  0x15   : > { %p1103_p12 = scmp.ne.s32.totalorder %s104_s12, %s1102_s22  ;;  %p1111_p4 = scmp.lt.s32.totalorder %s1102_s22, %s1102_s22 }
  0x17   : > { %p1105_p13 = pnand %p1103_p12, %p1091_p7  ;;  %p1112_p3 = por %p1111_p4, %p1110_p1 }
  0x19   : > { %p1106_p0 = pneg %p1105_p13 }
  0x1b   : > { %p1113_p2 = pnand %p1112_p3, %p1106_p0 }
  0x1d   : > { %1116 = shalt.err (!%p1113_p2)
}
  0x1e   : > { %s1130_s23 = smov 1024   ;;  %s1131_s24 = smov 64  }
  0x1f   : > { %1074 = dma.hbm_to_vmem [thread:$0]  (!%p1166_p5), %s1224_s1, 32768, %s104_s12, [#allocation3], %s1130_s23, %s1130_s23, %s1131_s24  }
  0x20   : > { %p1230_p6 = scmp.ne.s32.totalorder %s1228_s13, 0 }
  0x21   : > { %p1231_p8 = scmp.eq.s32.totalorder (!%p1230_p6), %s1153_s10, 0 }
  0x22   : > { %127 = sbr.rel (%p1230_p6) target bundleno = 391 (0x187), region = 28 }
  0x29   : > { %1122 = dma.done.wait (%p1231_p8), [#allocation3], 32768   ;;  %p1232_p7 = pmov %p1231_p8 }
  0x2a   : > { %v160_v0 = vld [vmem:[#allocation2 + $0x8] sm:$0xff]  ;;  %v162_v2 = vld [vmem:[#allocation2 + $0x18] sm:$0xff]  ;;  %v159_v5 = vld [vmem:[#allocation2] sm:$0xff]  ;;  %p149_p2 = scmp.lt.s32.totalorder %s1153_s10, 1 }
  0x2b   : > { %1124 = vsyncadd (%p1232_p7), [#allocation3], 4294934528  ;;  %v168_v1 = vld [vmem:[#allocation2 + $0x48] sm:$0xff]  ;;  %v170_v4 = vld [vmem:[#allocation2 + $0x58] sm:$0xff] }
  0x2c   : > { %v811_v3 = vpack.c.bf16 %v168_v1, %v160_v0  ;;  %v167_v6 = vld [vmem:[#allocation2 + $0x40] sm:$0xff]  ;;  %v875_v7 = vpack.c.bf16 %v170_v4, %v162_v2  ;;  %v161_v9 = vld [vmem:[#allocation2 + $0x10] sm:$0xff]  ;;  %v176_v11 = vld [vmem:[#allocation2 + $0x88] sm:$0xff]  ;;  %s1234_s10 = smov (!%p149_p2, %s1153_s10), 1 }
  0x2d   : > { %v813_v8 = vpack.c.bf16 %v167_v6, %v159_v5  ;;  %v169_v10 = vld [vmem:[#allocation2 + $0x50] sm:$0xff]  ;;  %v184_v13 = vld [vmem:[#allocation2 + $0xc8] sm:$0xff]  ;;  %v178_v14 = vld [vmem:[#allocation2 + $0x98] sm:$0xff]  ;;  %s809_s27 = sshll.u32 %s1234_s10, 3  ;;  %s810_s3 = sshll.u32 %s1234_s10, 5 }
  0x2e   : > { %812 = vmatprep.subr.bf16.mxu0 %v811_v3  ;;  %v877_v12 = vpack.c.bf16 %v169_v10, %v161_v9  ;;  %v186_v15 = vld [vmem:[#allocation2 + $0xd8] sm:$0xff]  ;;  %876 = vmatprep.subr.bf16.mxu1 %v875_v7  ;;  %v815_v16 = vpack.c.bf16 %v184_v13, %v176_v11  ;;  %v175_v18 = vld [vmem:[#allocation2 + $0x80] sm:$0xff]  ;;  %v177_v20 = vld [vmem:[#allocation2 + $0x90] sm:$0xff]  ;;  %s153_s30 = scalar_lea.vmem %s1223_s0, %s809_s27  ;;  %s158_s6 = scalar_lea.vmem %s1225_s2, %s810_s3 }
  0x2f   : > { %814 = vmatpush1.bf16.msra.mxu0 %v813_v8  ;;  %v879_v17 = vpack.c.bf16 %v186_v15, %v178_v14  ;;  %v183_v19 = vld [vmem:[#allocation2 + $0xc0] sm:$0xff]  ;;  %v185_v22 = vld [vmem:[#allocation2 + $0xd0] sm:$0xff]  ;;  %v192_v23 = vld [vmem:[#allocation2 + $0x108] sm:$0xff] }
  0x30   : > { %878 = vmatpush1.bf16.msra.mxu1 %v877_v12  ;;  %v817_v21 = vpack.c.bf16 %v183_v19, %v175_v18  ;;  %v200_v24 = vld [vmem:[#allocation2 + $0x148] sm:$0xff]  ;;  %816 = vmatprep.subr.bf16.mxu0 %v815_v16  ;;  %v881_v25 = vpack.c.bf16 %v185_v22, %v177_v20  ;;  %v194_v27 = vld [vmem:[#allocation2 + $0x118] sm:$0xff]  ;;  %v191_v29 = vld [vmem:[#allocation2 + $0x100] sm:$0xff] }
  0x31   : > { %880 = vmatprep.subr.bf16.mxu1 %v879_v17  ;;  %v819_v26 = vpack.c.bf16 %v200_v24, %v192_v23  ;;  %v202_v28 = vld [vmem:[#allocation2 + $0x158] sm:$0xff]  ;;  %v199_v31 = vld [vmem:[#allocation2 + $0x140] sm:$0xff]  ;;  %v193_v32 = vld [vmem:[#allocation2 + $0x110] sm:$0xff] }
  0x32   : > { %v883_v30 = vpack.c.bf16 %v202_v28, %v194_v27  ;;  %v201_v33 = vld [vmem:[#allocation2 + $0x150] sm:$0xff]  ;;  %v821_v34 = vpack.c.bf16 %v199_v31, %v191_v29  ;;  %v208_v35 = vld [vmem:[#allocation2 + $0x188] sm:$0xff]  ;;  %v210_v37 = vld [vmem:[#allocation2 + $0x198] sm:$0xff] }
  0x33   : > { %818 = vmatpush1.bf16.msra.mxu0 %v817_v21  ;;  %v216_v36 = vld [vmem:[#allocation2 + $0x1c8] sm:$0xff]  ;;  %v885_v38 = vpack.c.bf16 %v201_v33, %v193_v32  ;;  %v218_v40 = vld [vmem:[#allocation2 + $0x1d8] sm:$0xff]  ;;  %v207_v41 = vld [vmem:[#allocation2 + $0x180] sm:$0xff] }
  0x34   : > { %882 = vmatpush1.bf16.msra.mxu1 %v881_v25  ;;  %820 = vmatprep.subr.bf16.mxu0 %v819_v26  ;;  %v823_v39 = vpack.c.bf16 %v216_v36, %v208_v35  ;;  %v215_v42 = vld [vmem:[#allocation2 + $0x1c0] sm:$0xff]  ;;  %v887_v43 = vpack.c.bf16 %v218_v40, %v210_v37  ;;  %v209_v44 = vld [vmem:[#allocation2 + $0x190] sm:$0xff]  ;;  %v224_v46 = vld [vmem:[#allocation2 + $0x208] sm:$0xff] }
  0x35   : > { %884 = vmatprep.subr.bf16.mxu1 %v883_v30  ;;  %v217_v45 = vld [vmem:[#allocation2 + $0x1d0] sm:$0xff]  ;;  %v232_v47 = vld [vmem:[#allocation2 + $0x248] sm:$0xff]  ;;  %v226_v48 = vld [vmem:[#allocation2 + $0x218] sm:$0xff]  ;;  %v825_v50 = vpack.c.bf16 %v215_v42, %v207_v41 }
  0x36   : > { %v234_v49 = vld [vmem:[#allocation2 + $0x258] sm:$0xff]  ;;  %v889_v51 = vpack.c.bf16 %v217_v45, %v209_v44  ;;  %v827_v52 = vpack.c.bf16 %v232_v47, %v224_v46  ;;  %v223_v53 = vld [vmem:[#allocation2 + $0x200] sm:$0xff]  ;;  %v225_v55 = vld [vmem:[#allocation2 + $0x210] sm:$0xff] }
  0x37   : > { %822 = vmatpush1.bf16.msra.mxu0 %v821_v34  ;;  %v231_v54 = vld [vmem:[#allocation2 + $0x240] sm:$0xff]  ;;  %v891_v56 = vpack.c.bf16 %v234_v49, %v226_v48  ;;  %v233_v57 = vld [vmem:[#allocation2 + $0x250] sm:$0xff]  ;;  %v240_v58 = vld [vmem:[#allocation2 + $0x288] sm:$0xff] }
  0x38   : > { %886 = vmatpush1.bf16.msra.mxu1 %v885_v38  ;;  %824 = vmatprep.subr.bf16.mxu0 %v823_v39  ;;  %v248_v59 = vld [vmem:[#allocation2 + $0x2c8] sm:$0xff]  ;;  %v242_v60 = vld [vmem:[#allocation2 + $0x298] sm:$0xff]  ;;  %v829_v62 = vpack.c.bf16 %v231_v54, %v223_v53  ;;  %v893_v63 = vpack.c.bf16 %v233_v57, %v225_v55  ;;  %v239_v1 = vld [vmem:[#allocation2 + $0x280] sm:$0xff] }
  0x39   : > { %888 = vmatprep.subr.bf16.mxu1 %v887_v43  ;;  %v250_v61 = vld [vmem:[#allocation2 + $0x2d8] sm:$0xff]  ;;  %v831_v0 = vpack.c.bf16 %v248_v59, %v240_v58  ;;  %v247_v2 = vld [vmem:[#allocation2 + $0x2c0] sm:$0xff]  ;;  %v241_v3 = vld [vmem:[#allocation2 + $0x290] sm:$0xff] }
  0x3a   : > { %v895_v4 = vpack.c.bf16 %v250_v61, %v242_v60  ;;  %v249_v5 = vld [vmem:[#allocation2 + $0x2d0] sm:$0xff]  ;;  %v256_v6 = vld [vmem:[#allocation2 + $0x308] sm:$0xff]  ;;  %v258_v8 = vld [vmem:[#allocation2 + $0x318] sm:$0xff]  ;;  %v833_v10 = vpack.c.bf16 %v247_v2, %v239_v1 }
  0x3b   : > { %826 = vmatpush1.bf16.msra.mxu0 %v825_v50  ;;  %v264_v7 = vld [vmem:[#allocation2 + $0x348] sm:$0xff]  ;;  %v266_v9 = vld [vmem:[#allocation2 + $0x358] sm:$0xff]  ;;  %v897_v11 = vpack.c.bf16 %v249_v5, %v241_v3  ;;  %v255_v13 = vld [vmem:[#allocation2 + $0x300] sm:$0xff] }
  0x3c   : > { %890 = vmatpush1.bf16.msra.mxu1 %v889_v51  ;;  %828 = vmatprep.subr.bf16.mxu0 %v827_v52  ;;  %v835_v12 = vpack.c.bf16 %v264_v7, %v256_v6  ;;  %v263_v14 = vld [vmem:[#allocation2 + $0x340] sm:$0xff]  ;;  %v257_v15 = vld [vmem:[#allocation2 + $0x310] sm:$0xff]  ;;  %v899_v16 = vpack.c.bf16 %v266_v9, %v258_v8  ;;  %v272_v18 = vld [vmem:[#allocation2 + $0x388] sm:$0xff] }
  0x3d   : > { %892 = vmatprep.subr.bf16.mxu1 %v891_v56  ;;  %v265_v17 = vld [vmem:[#allocation2 + $0x350] sm:$0xff]  ;;  %v280_v19 = vld [vmem:[#allocation2 + $0x3c8] sm:$0xff]  ;;  %v274_v20 = vld [vmem:[#allocation2 + $0x398] sm:$0xff]  ;;  %v837_v22 = vpack.c.bf16 %v263_v14, %v255_v13 }
  0x3e   : > { %v282_v21 = vld [vmem:[#allocation2 + $0x3d8] sm:$0xff]  ;;  %v901_v23 = vpack.c.bf16 %v265_v17, %v257_v15  ;;  %v839_v24 = vpack.c.bf16 %v280_v19, %v272_v18  ;;  %v271_v25 = vld [vmem:[#allocation2 + $0x380] sm:$0xff]  ;;  %v273_v27 = vld [vmem:[#allocation2 + $0x390] sm:$0xff] }
  0x3f   : > { %830 = vmatpush1.bf16.msra.mxu0 %v829_v62  ;;  %v279_v26 = vld [vmem:[#allocation2 + $0x3c0] sm:$0xff]  ;;  %v903_v28 = vpack.c.bf16 %v282_v21, %v274_v20  ;;  %v281_v29 = vld [vmem:[#allocation2 + $0x3d0] sm:$0xff]  ;;  %v288_v30 = vld [vmem:[#allocation2 + $0x408] sm:$0xff] }
  0x40   : > { %894 = vmatpush1.bf16.msra.mxu1 %v893_v63  ;;  %832 = vmatprep.subr.bf16.mxu0 %v831_v0  ;;  %v296_v31 = vld [vmem:[#allocation2 + $0x448] sm:$0xff]  ;;  %v290_v32 = vld [vmem:[#allocation2 + $0x418] sm:$0xff]  ;;  %v841_v34 = vpack.c.bf16 %v279_v26, %v271_v25  ;;  %v905_v35 = vpack.c.bf16 %v281_v29, %v273_v27  ;;  %v287_v37 = vld [vmem:[#allocation2 + $0x400] sm:$0xff] }
  0x41   : > { %896 = vmatprep.subr.bf16.mxu1 %v895_v4  ;;  %v298_v33 = vld [vmem:[#allocation2 + $0x458] sm:$0xff]  ;;  %v843_v36 = vpack.c.bf16 %v296_v31, %v288_v30  ;;  %v295_v38 = vld [vmem:[#allocation2 + $0x440] sm:$0xff]  ;;  %v289_v39 = vld [vmem:[#allocation2 + $0x410] sm:$0xff] }
  0x42   : > { %v907_v40 = vpack.c.bf16 %v298_v33, %v290_v32  ;;  %v297_v41 = vld [vmem:[#allocation2 + $0x450] sm:$0xff]  ;;  %v304_v42 = vld [vmem:[#allocation2 + $0x488] sm:$0xff]  ;;  %v306_v44 = vld [vmem:[#allocation2 + $0x498] sm:$0xff]  ;;  %v845_v46 = vpack.c.bf16 %v295_v38, %v287_v37 }
  0x43   : > { %834 = vmatpush1.bf16.msra.mxu0 %v833_v10  ;;  %v312_v43 = vld [vmem:[#allocation2 + $0x4c8] sm:$0xff]  ;;  %v314_v45 = vld [vmem:[#allocation2 + $0x4d8] sm:$0xff]  ;;  %v909_v47 = vpack.c.bf16 %v297_v41, %v289_v39  ;;  %v303_v49 = vld [vmem:[#allocation2 + $0x480] sm:$0xff] }
  0x44   : > { %898 = vmatpush1.bf16.msra.mxu1 %v897_v11  ;;  %836 = vmatprep.subr.bf16.mxu0 %v835_v12  ;;  %v847_v48 = vpack.c.bf16 %v312_v43, %v304_v42  ;;  %v311_v50 = vld [vmem:[#allocation2 + $0x4c0] sm:$0xff]  ;;  %v305_v51 = vld [vmem:[#allocation2 + $0x490] sm:$0xff]  ;;  %v911_v52 = vpack.c.bf16 %v314_v45, %v306_v44  ;;  %v320_v54 = vld [vmem:[#allocation2 + $0x508] sm:$0xff] }
  0x45   : > { %900 = vmatprep.subr.bf16.mxu1 %v899_v16  ;;  %v313_v53 = vld [vmem:[#allocation2 + $0x4d0] sm:$0xff]  ;;  %v328_v55 = vld [vmem:[#allocation2 + $0x548] sm:$0xff]  ;;  %v322_v56 = vld [vmem:[#allocation2 + $0x518] sm:$0xff]  ;;  %v849_v58 = vpack.c.bf16 %v311_v50, %v303_v49 }
  0x46   : > { %v330_v57 = vld [vmem:[#allocation2 + $0x558] sm:$0xff]  ;;  %v913_v59 = vpack.c.bf16 %v313_v53, %v305_v51  ;;  %v851_v60 = vpack.c.bf16 %v328_v55, %v320_v54  ;;  %v319_v61 = vld [vmem:[#allocation2 + $0x500] sm:$0xff]  ;;  %v321_v63 = vld [vmem:[#allocation2 + $0x510] sm:$0xff] }
  0x47   : > { %838 = vmatpush1.bf16.msra.mxu0 %v837_v22  ;;  %v327_v62 = vld [vmem:[#allocation2 + $0x540] sm:$0xff]  ;;  %v915_v0 = vpack.c.bf16 %v330_v57, %v322_v56  ;;  %v329_v1 = vld [vmem:[#allocation2 + $0x550] sm:$0xff]  ;;  %v336_v2 = vld [vmem:[#allocation2 + $0x588] sm:$0xff] }
  0x48   : > { %902 = vmatpush1.bf16.msra.mxu1 %v901_v23  ;;  %840 = vmatprep.subr.bf16.mxu0 %v839_v24  ;;  %v344_v3 = vld [vmem:[#allocation2 + $0x5c8] sm:$0xff]  ;;  %v338_v4 = vld [vmem:[#allocation2 + $0x598] sm:$0xff]  ;;  %v853_v6 = vpack.c.bf16 %v327_v62, %v319_v61  ;;  %v335_v7 = vld [vmem:[#allocation2 + $0x580] sm:$0xff]  ;;  %v917_v8 = vpack.c.bf16 %v329_v1, %v321_v63 }
  0x49   : > { %904 = vmatprep.subr.bf16.mxu1 %v903_v28  ;;  %v346_v5 = vld [vmem:[#allocation2 + $0x5d8] sm:$0xff]  ;;  %v855_v9 = vpack.c.bf16 %v344_v3, %v336_v2  ;;  %v343_v10 = vld [vmem:[#allocation2 + $0x5c0] sm:$0xff]  ;;  %v337_v11 = vld [vmem:[#allocation2 + $0x590] sm:$0xff] }
  0x4a   : > { %v345_v12 = vld [vmem:[#allocation2 + $0x5d0] sm:$0xff]  ;;  %v919_v13 = vpack.c.bf16 %v346_v5, %v338_v4  ;;  %v352_v14 = vld [vmem:[#allocation2 + $0x608] sm:$0xff]  ;;  %v1202_v16 = vld [vmem:[%s153_s30] sm:$0xff]  ;;  %v857_v20 = vpack.c.bf16 %v343_v10, %v335_v7 }
  0x4b   : > { %842 = vmatpush1.bf16.msra.mxu0 %v841_v34  ;;  %v360_v15 = vld [vmem:[#allocation2 + $0x648] sm:$0xff]  ;;  %v354_v17 = vld [vmem:[#allocation2 + $0x618] sm:$0xff]  ;;  %v1206_v19 = vcombine.high %v1202_v16, %v1202_v16  ;;  %v921_v21 = vpack.c.bf16 %v345_v12, %v337_v11  ;;  %v351_v23 = vld [vmem:[#allocation2 + $0x600] sm:$0xff] }
  0x4c   : > { %906 = vmatpush1.bf16.msra.mxu1 %v905_v35  ;;  %844 = vmatprep.subr.bf16.mxu0 %v843_v36  ;;  %v362_v18 = vld [vmem:[#allocation2 + $0x658] sm:$0xff]  ;;  %v859_v22 = vpack.c.bf16 %v360_v15, %v352_v14  ;;  %v359_v24 = vld [vmem:[#allocation2 + $0x640] sm:$0xff]  ;;  %v353_v25 = vld [vmem:[#allocation2 + $0x610] sm:$0xff] }
  0x4d   : > { %908 = vmatprep.subr.bf16.mxu1 %v907_v40  ;;  %v923_v26 = vpack.c.bf16 %v362_v18, %v354_v17  ;;  %v361_v27 = vld [vmem:[#allocation2 + $0x650] sm:$0xff]  ;;  %v368_v28 = vld [vmem:[#allocation2 + $0x688] sm:$0xff]  ;;  %483 = vmatprep.mubr.f32.mxu0 %v1206_v19  ;;  %v370_v30 = vld [vmem:[#allocation2 + $0x698] sm:$0xff]  ;;  %v861_v32 = vpack.c.bf16 %v359_v24, %v351_v23 }
  0x4e   : > { %v376_v29 = vld [vmem:[#allocation2 + $0x6c8] sm:$0xff]  ;;  %v378_v31 = vld [vmem:[#allocation2 + $0x6d8] sm:$0xff]  ;;  %554 = vmatprep.mubr.f32.mxu1 %v1206_v19  ;;  %v925_v33 = vpack.c.bf16 %v361_v27, %v353_v25  ;;  %v367_v35 = vld [vmem:[#allocation2 + $0x680] sm:$0xff] }
  0x4f   : > { %846 = vmatpush1.bf16.msra.mxu0 %v845_v46  ;;  %v863_v34 = vpack.c.bf16 %v376_v29, %v368_v28  ;;  %v375_v36 = vld [vmem:[#allocation2 + $0x6c0] sm:$0xff]  ;;  %v369_v37 = vld [vmem:[#allocation2 + $0x690] sm:$0xff]  ;;  %v927_v38 = vpack.c.bf16 %v378_v31, %v370_v30  ;;  %v384_v40 = vld [vmem:[#allocation2 + $0x708] sm:$0xff] }
  0x50   : > { %910 = vmatpush1.bf16.msra.mxu1 %v909_v47  ;;  %848 = vmatprep.subr.bf16.mxu0 %v847_v48  ;;  %v377_v39 = vld [vmem:[#allocation2 + $0x6d0] sm:$0xff]  ;;  %v392_v41 = vld [vmem:[#allocation2 + $0x748] sm:$0xff]  ;;  %v386_v42 = vld [vmem:[#allocation2 + $0x718] sm:$0xff]  ;;  %v865_v44 = vpack.c.bf16 %v375_v36, %v367_v35 }
  0x51   : > { %912 = vmatprep.subr.bf16.mxu1 %v911_v52  ;;  %v394_v43 = vld [vmem:[#allocation2 + $0x758] sm:$0xff]  ;;  %v929_v45 = vpack.c.bf16 %v377_v39, %v369_v37  ;;  %v867_v46 = vpack.c.bf16 %v392_v41, %v384_v40  ;;  %v383_v47 = vld [vmem:[#allocation2 + $0x700] sm:$0xff]  ;;  %v385_v49 = vld [vmem:[#allocation2 + $0x710] sm:$0xff] }
  0x52   : > { %v391_v48 = vld [vmem:[#allocation2 + $0x740] sm:$0xff]  ;;  %v931_v50 = vpack.c.bf16 %v394_v43, %v386_v42  ;;  %v393_v51 = vld [vmem:[#allocation2 + $0x750] sm:$0xff]  ;;  %v400_v52 = vld [vmem:[#allocation2 + $0x788] sm:$0xff] }
  0x53   : > { %850 = vmatpush1.bf16.msra.mxu0 %v849_v58  ;;  %v408_v53 = vld [vmem:[#allocation2 + $0x7c8] sm:$0xff]  ;;  %v402_v54 = vld [vmem:[#allocation2 + $0x798] sm:$0xff]  ;;  %v869_v56 = vpack.c.bf16 %v391_v48, %v383_v47  ;;  %v933_v57 = vpack.c.bf16 %v393_v51, %v385_v49  ;;  %v401_v61 = vld [vmem:[#allocation2 + $0x790] sm:$0xff] }
  0x54   : > { %914 = vmatpush1.bf16.msra.mxu1 %v913_v59  ;;  %852 = vmatprep.subr.bf16.mxu0 %v851_v60  ;;  %v410_v55 = vld [vmem:[#allocation2 + $0x7d8] sm:$0xff]  ;;  %v871_v58 = vpack.c.bf16 %v408_v53, %v400_v52  ;;  %v399_v59 = vld [vmem:[#allocation2 + $0x780] sm:$0xff]  ;;  %v409_v63 = vld [vmem:[#allocation2 + $0x7d0] sm:$0xff] }
  0x55   : > { %916 = vmatprep.subr.bf16.mxu1 %v915_v0  ;;  %v407_v60 = vld [vmem:[#allocation2 + $0x7c0] sm:$0xff]  ;;  %v935_v62 = vpack.c.bf16 %v410_v55, %v402_v54  ;;  %v164_v0 = vld [vmem:[#allocation2 + $0x28] sm:$0xff]  ;;  %v166_v2 = vld [vmem:[#allocation2 + $0x38] sm:$0xff]  ;;  %v937_v5 = vpack.c.bf16 %v409_v63, %v401_v61 }
  0x56   : > { %v172_v1 = vld [vmem:[#allocation2 + $0x68] sm:$0xff]  ;;  %v174_v3 = vld [vmem:[#allocation2 + $0x78] sm:$0xff]  ;;  %v873_v4 = vpack.c.bf16 %v407_v60, %v399_v59  ;;  %v163_v7 = vld [vmem:[#allocation2 + $0x20] sm:$0xff] }
  0x57   : > { %854 = vmatpush1.bf16.msra.mxu0 %v853_v6  ;;  %v939_v6 = vpack.c.bf16 %v172_v1, %v164_v0  ;;  %v1003_v10 = vpack.c.bf16 %v174_v3, %v166_v2  ;;  %v173_v11 = vld [vmem:[#allocation2 + $0x70] sm:$0xff]  ;;  %v180_v12 = vld [vmem:[#allocation2 + $0xa8] sm:$0xff]  ;;  %v182_v14 = vld [vmem:[#allocation2 + $0xb8] sm:$0xff] }
  0x58   : > { %918 = vmatpush1.bf16.msra.mxu1 %v917_v8  ;;  %856 = vmatprep.subr.bf16.mxu0 %v855_v9  ;;  %v171_v8 = vld [vmem:[#allocation2 + $0x60] sm:$0xff]  ;;  %v165_v9 = vld [vmem:[#allocation2 + $0x30] sm:$0xff]  ;;  %v190_v15 = vld [vmem:[#allocation2 + $0xf8] sm:$0xff] }
  0x59   : > { %920 = vmatprep.subr.bf16.mxu1 %v919_v13  ;;  %v188_v13 = vld [vmem:[#allocation2 + $0xe8] sm:$0xff]  ;;  %v941_v17 = vpack.c.bf16 %v171_v8, %v163_v7  ;;  %v1005_v18 = vpack.c.bf16 %v173_v11, %v165_v9  ;;  %v181_v23 = vld [vmem:[#allocation2 + $0xb0] sm:$0xff]  ;;  %v1007_v24 = vpack.c.bf16 %v190_v15, %v182_v14  ;;  %v198_v28 = vld [vmem:[#allocation2 + $0x138] sm:$0xff] }
  0x5a   : > { %v189_v25 = vld [vmem:[#allocation2 + $0xf0] sm:$0xff]  ;;  %v204_v27 = vld [vmem:[#allocation2 + $0x168] sm:$0xff]  ;;  %v206_v29 = vld [vmem:[#allocation2 + $0x178] sm:$0xff] }
  0x5b   : > { %858 = vmatpush1.bf16.msra.mxu0 %v857_v20  ;;  %v943_v20 = vpack.c.bf16 %v188_v13, %v180_v12  ;;  %v1009_v31 = vpack.c.bf16 %v189_v25, %v181_v23  ;;  %v197_v35 = vld [vmem:[#allocation2 + $0x130] sm:$0xff]  ;;  %v1011_v36 = vpack.c.bf16 %v206_v29, %v198_v28  ;;  %v220_v39 = vld [vmem:[#allocation2 + $0x1e8] sm:$0xff]  ;;  %v214_v40 = vld [vmem:[#allocation2 + $0x1b8] sm:$0xff] }
  0x5c   : > { %922 = vmatpush1.bf16.msra.mxu1 %v921_v21  ;;  %860 = vmatprep.subr.bf16.mxu0 %v859_v22  ;;  %v179_v21 = vld [vmem:[#allocation2 + $0xa0] sm:$0xff]  ;;  %v205_v37 = vld [vmem:[#allocation2 + $0x170] sm:$0xff]  ;;  %v222_v41 = vld [vmem:[#allocation2 + $0x1f8] sm:$0xff] }
  0x5d   : > { %924 = vmatprep.subr.bf16.mxu1 %v923_v26  ;;  %v187_v22 = vld [vmem:[#allocation2 + $0xe0] sm:$0xff]  ;;  %v196_v26 = vld [vmem:[#allocation2 + $0x128] sm:$0xff]  ;;  %v1013_v43 = vpack.c.bf16 %v205_v37, %v197_v35  ;;  %v213_v47 = vld [vmem:[#allocation2 + $0x1b0] sm:$0xff]  ;;  %v1015_v48 = vpack.c.bf16 %v222_v41, %v214_v40 }
  0x5e   : > { %v945_v30 = vpack.c.bf16 %v187_v22, %v179_v21  ;;  %v221_v49 = vld [vmem:[#allocation2 + $0x1f0] sm:$0xff]  ;;  %v236_v51 = vld [vmem:[#allocation2 + $0x268] sm:$0xff]  ;;  %v230_v52 = vld [vmem:[#allocation2 + $0x238] sm:$0xff] }
  0x5f   : > { %862 = vmatpush1.bf16.msra.mxu0 %v861_v32  ;;  %v947_v32 = vpack.c.bf16 %v204_v27, %v196_v26  ;;  %v238_v53 = vld [vmem:[#allocation2 + $0x278] sm:$0xff]  ;;  %v237_v60 = vld [vmem:[#allocation2 + $0x270] sm:$0xff]  ;;  %v244_v61 = vld [vmem:[#allocation2 + $0x2a8] sm:$0xff] }
  0x60   : > { %926 = vmatpush1.bf16.msra.mxu1 %v925_v33  ;;  %864 = vmatprep.subr.bf16.mxu0 %v863_v34  ;;  %v195_v33 = vld [vmem:[#allocation2 + $0x120] sm:$0xff]  ;;  %v1019_v59 = vpack.c.bf16 %v238_v53, %v230_v52  ;;  %v246_v63 = vld [vmem:[#allocation2 + $0x2b8] sm:$0xff]  ;;  %v253_v8 = vld [vmem:[#allocation2 + $0x2f0] sm:$0xff] }
  0x61   : > { %928 = vmatprep.subr.bf16.mxu1 %v927_v38  ;;  %v203_v34 = vld [vmem:[#allocation2 + $0x160] sm:$0xff]  ;;  %v212_v38 = vld [vmem:[#allocation2 + $0x1a8] sm:$0xff]  ;;  %v254_v0 = vld [vmem:[#allocation2 + $0x2f8] sm:$0xff] }
  0x62   : > { %v949_v42 = vpack.c.bf16 %v203_v34, %v195_v33  ;;  %v1023_v7 = vpack.c.bf16 %v254_v0, %v246_v63  ;;  %v260_v9 = vld [vmem:[#allocation2 + $0x328] sm:$0xff]  ;;  %v262_v11 = vld [vmem:[#allocation2 + $0x338] sm:$0xff]  ;;  %v269_v22 = vld [vmem:[#allocation2 + $0x370] sm:$0xff] }
  0x63   : > { %866 = vmatpush1.bf16.msra.mxu0 %v865_v44  ;;  %v951_v44 = vpack.c.bf16 %v220_v39, %v212_v38  ;;  %v270_v12 = vld [vmem:[#allocation2 + $0x378] sm:$0xff]  ;;  %v276_v23 = vld [vmem:[#allocation2 + $0x3a8] sm:$0xff]  ;;  %v285_v34 = vld [vmem:[#allocation2 + $0x3f0] sm:$0xff] }
  0x64   : > { %930 = vmatpush1.bf16.msra.mxu1 %v929_v45  ;;  %868 = vmatprep.subr.bf16.mxu0 %v867_v46  ;;  %v211_v45 = vld [vmem:[#allocation2 + $0x1a0] sm:$0xff]  ;;  %v1027_v21 = vpack.c.bf16 %v270_v12, %v262_v11  ;;  %v278_v25 = vld [vmem:[#allocation2 + $0x3b8] sm:$0xff]  ;;  %v292_v35 = vld [vmem:[#allocation2 + $0x428] sm:$0xff] }
  0x65   : > { %932 = vmatprep.subr.bf16.mxu1 %v931_v50  ;;  %v219_v46 = vld [vmem:[#allocation2 + $0x1e0] sm:$0xff]  ;;  %v228_v50 = vld [vmem:[#allocation2 + $0x228] sm:$0xff]  ;;  %v286_v26 = vld [vmem:[#allocation2 + $0x3f8] sm:$0xff] }
  0x66   : > { %v953_v54 = vpack.c.bf16 %v219_v46, %v211_v45  ;;  %v955_v55 = vpack.c.bf16 %v236_v51, %v228_v50  ;;  %v1031_v33 = vpack.c.bf16 %v286_v26, %v278_v25  ;;  %v294_v37 = vld [vmem:[#allocation2 + $0x438] sm:$0xff]  ;;  %v301_v46 = vld [vmem:[#allocation2 + $0x470] sm:$0xff] }
  0x67   : > { %870 = vmatpush1.bf16.msra.mxu0 %v869_v56  ;;  %v227_v56 = vld [vmem:[#allocation2 + $0x220] sm:$0xff]  ;;  %v302_v38 = vld [vmem:[#allocation2 + $0x478] sm:$0xff] }
  0x68   : > { %934 = vmatpush1.bf16.msra.mxu1 %v933_v57  ;;  %872 = vmatprep.subr.bf16.mxu0 %v871_v58  ;;  %v235_v57 = vld [vmem:[#allocation2 + $0x260] sm:$0xff]  ;;  %v229_v58 = vld [vmem:[#allocation2 + $0x230] sm:$0xff]  ;;  %v1035_v45 = vpack.c.bf16 %v302_v38, %v294_v37  ;;  %v318_v50 = vld [vmem:[#allocation2 + $0x4f8] sm:$0xff] }
  0x69   : > { %936 = vmatprep.subr.bf16.mxu1 %v935_v62  ;;  %v252_v62 = vld [vmem:[#allocation2 + $0x2e8] sm:$0xff]  ;;  %v957_v1 = vpack.c.bf16 %v235_v57, %v227_v56  ;;  %v1021_v2 = vpack.c.bf16 %v237_v60, %v229_v58  ;;  %v317_v57 = vld [vmem:[#allocation2 + $0x4f0] sm:$0xff]  ;;  %v326_v60 = vld [vmem:[#allocation2 + $0x538] sm:$0xff] }
  0x6a   : > { %v959_v3 = vpack.c.bf16 %v252_v62, %v244_v61  ;;  %v324_v58 = vld [vmem:[#allocation2 + $0x528] sm:$0xff]  ;;  %v334_v61 = vld [vmem:[#allocation2 + $0x578] sm:$0xff] }
  0x6b   : > { %874 = vmatpush1.bf16.msra.mxu0 %v873_v4  ;;  %v243_v4 = vld [vmem:[#allocation2 + $0x2a0] sm:$0xff] }
  0x6c   : > { %938 = vmatpush1.bf16.msra.mxu1 %v937_v5  ;;  %940 = vmatprep.subr.bf16.mxu0 %v939_v6  ;;  %v251_v5 = vld [vmem:[#allocation2 + $0x2e0] sm:$0xff]  ;;  %v245_v6 = vld [vmem:[#allocation2 + $0x2b0] sm:$0xff] }
  0x6d   : > { %1004 = vmatprep.subr.bf16.mxu1 %v1003_v10  ;;  %v268_v10 = vld [vmem:[#allocation2 + $0x368] sm:$0xff]  ;;  %v961_v13 = vpack.c.bf16 %v251_v5, %v243_v4  ;;  %v1025_v14 = vpack.c.bf16 %v253_v8, %v245_v6  ;;  %v1043_v4 = vpack.c.bf16 %v334_v61, %v326_v60  ;;  %v333_v5 = vld [vmem:[#allocation2 + $0x570] sm:$0xff]  ;;  %v342_v8 = vld [vmem:[#allocation2 + $0x5b8] sm:$0xff] }
  0x6e   : > { %484 = vmatmul.mubr.f32.vlgmr.msra.gmra.mrb[0].mxu0 %v1202_v16  ;;  %v963_v15 = vpack.c.bf16 %v268_v10, %v260_v9  ;;  %v340_v6 = vld [vmem:[#allocation2 + $0x5a8] sm:$0xff]  ;;  %v350_v9 = vld [vmem:[#allocation2 + $0x5f8] sm:$0xff] }
  0x6f   : > { %555 = vmatmul.mubr.f32.vlgmr.msra.gmra.mrb[0].mxu1 %v1202_v16  ;;  %942 = vmatpush1.bf16.msra.mxu0 %v941_v17  ;;  %v259_v17 = vld [vmem:[#allocation2 + $0x320] sm:$0xff] }
  0x70   : > { %1006 = vmatpush1.bf16.msra.mxu1 %v1005_v18  ;;  %944 = vmatprep.subr.bf16.mxu0 %v943_v20  ;;  %v267_v18 = vld [vmem:[#allocation2 + $0x360] sm:$0xff]  ;;  %v261_v20 = vld [vmem:[#allocation2 + $0x330] sm:$0xff] }
  0x71   : > { %1008 = vmatprep.subr.bf16.mxu1 %v1007_v24  ;;  %625 = vmatprep.mubr.f32.mxu0 %v1206_v19  ;;  %v284_v24 = vld [vmem:[#allocation2 + $0x3e8] sm:$0xff]  ;;  %v965_v27 = vpack.c.bf16 %v267_v18, %v259_v17  ;;  %v1029_v28 = vpack.c.bf16 %v269_v22, %v261_v20  ;;  %v1047_v17 = vpack.c.bf16 %v350_v9, %v342_v8  ;;  %v349_v18 = vld [vmem:[#allocation2 + $0x5f0] sm:$0xff]  ;;  %v358_v22 = vld [vmem:[#allocation2 + $0x638] sm:$0xff] }
  0x72   : > { %696 = vmatprep.mubr.f32.mxu1 %v1206_v19  ;;  %v1017_v19 = vpack.c.bf16 %v221_v49, %v213_v47  ;;  %v967_v29 = vpack.c.bf16 %v284_v24, %v276_v23  ;;  %v308_v47 = vld [vmem:[#allocation2 + $0x4a8] sm:$0xff]  ;;  %v310_v49 = vld [vmem:[#allocation2 + $0x4b8] sm:$0xff] }
  0x73   : > { %946 = vmatpush1.bf16.msra.mxu0 %v945_v30  ;;  %v275_v30 = vld [vmem:[#allocation2 + $0x3a0] sm:$0xff]  ;;  %v1039_v56 = vpack.c.bf16 %v318_v50, %v310_v49  ;;  %v356_v20 = vld [vmem:[#allocation2 + $0x628] sm:$0xff]  ;;  %v366_v23 = vld [vmem:[#allocation2 + $0x678] sm:$0xff] }
  0x74   : > { %1010 = vmatpush1.bf16.msra.mxu1 %v1009_v31  ;;  %948 = vmatprep.subr.bf16.mxu0 %v947_v32  ;;  %v283_v31 = vld [vmem:[#allocation2 + $0x3e0] sm:$0xff]  ;;  %v277_v32 = vld [vmem:[#allocation2 + $0x3b0] sm:$0xff] }
  0x75   : > { %1012 = vmatprep.subr.bf16.mxu1 %v1011_v36  ;;  %v300_v36 = vld [vmem:[#allocation2 + $0x468] sm:$0xff]  ;;  %v969_v39 = vpack.c.bf16 %v283_v31, %v275_v30  ;;  %v1033_v40 = vpack.c.bf16 %v285_v34, %v277_v32  ;;  %v1051_v30 = vpack.c.bf16 %v366_v23, %v358_v22  ;;  %v365_v31 = vld [vmem:[#allocation2 + $0x670] sm:$0xff]  ;;  %v374_v34 = vld [vmem:[#allocation2 + $0x6b8] sm:$0xff] }
  0x76   : > { %v971_v41 = vpack.c.bf16 %v300_v36, %v292_v35  ;;  %v372_v32 = vld [vmem:[#allocation2 + $0x6a8] sm:$0xff]  ;;  %v382_v35 = vld [vmem:[#allocation2 + $0x6f8] sm:$0xff] }
  0x77   : > { %950 = vmatpush1.bf16.msra.mxu0 %v949_v42  ;;  %v291_v42 = vld [vmem:[#allocation2 + $0x420] sm:$0xff] }
  0x78   : > { %1014 = vmatpush1.bf16.msra.mxu1 %v1013_v43  ;;  %952 = vmatprep.subr.bf16.mxu0 %v951_v44  ;;  %v299_v43 = vld [vmem:[#allocation2 + $0x460] sm:$0xff]  ;;  %v293_v44 = vld [vmem:[#allocation2 + $0x430] sm:$0xff] }
  0x79   : > { %1016 = vmatprep.subr.bf16.mxu1 %v1015_v48  ;;  %v316_v48 = vld [vmem:[#allocation2 + $0x4e8] sm:$0xff]  ;;  %v973_v51 = vpack.c.bf16 %v299_v43, %v291_v42  ;;  %v1037_v52 = vpack.c.bf16 %v301_v46, %v293_v44  ;;  %v1055_v42 = vpack.c.bf16 %v382_v35, %v374_v34  ;;  %v381_v43 = vld [vmem:[#allocation2 + $0x6f0] sm:$0xff]  ;;  %v390_v46 = vld [vmem:[#allocation2 + $0x738] sm:$0xff] }
  0x7a   : > { %v975_v53 = vpack.c.bf16 %v316_v48, %v308_v47  ;;  %v388_v44 = vld [vmem:[#allocation2 + $0x728] sm:$0xff]  ;;  %v398_v47 = vld [vmem:[#allocation2 + $0x778] sm:$0xff] }
  0x7b   : > { %954 = vmatpush1.bf16.msra.mxu0 %v953_v54  ;;  %v307_v54 = vld [vmem:[#allocation2 + $0x4a0] sm:$0xff] }
  0x7c   : > { %1018 = vmatpush1.bf16.msra.mxu1 %v1017_v19  ;;  %956 = vmatprep.subr.bf16.mxu0 %v955_v55  ;;  %v315_v19 = vld [vmem:[#allocation2 + $0x4e0] sm:$0xff]  ;;  %v309_v55 = vld [vmem:[#allocation2 + $0x4b0] sm:$0xff] }
  0x7d   : > { %1020 = vmatprep.subr.bf16.mxu1 %v1019_v59  ;;  %v332_v59 = vld [vmem:[#allocation2 + $0x568] sm:$0xff]  ;;  %v977_v62 = vpack.c.bf16 %v315_v19, %v307_v54  ;;  %v1041_v63 = vpack.c.bf16 %v317_v57, %v309_v55  ;;  %v1059_v54 = vpack.c.bf16 %v398_v47, %v390_v46  ;;  %v397_v19 = vld [vmem:[#allocation2 + $0x770] sm:$0xff]  ;;  %v406_v57 = vld [vmem:[#allocation2 + $0x7b8] sm:$0xff] }
  0x7e   : > { %v979_v0 = vpack.c.bf16 %v332_v59, %v324_v58  ;;  %v404_v55 = vld [vmem:[#allocation2 + $0x7a8] sm:$0xff]  ;;  %v414_v58 = vld [vmem:[#allocation2 + $0x7f8] sm:$0xff] }
  0x7f   : > { %958 = vmatpush1.bf16.msra.mxu0 %v957_v1  ;;  %v323_v1 = vld [vmem:[#allocation2 + $0x520] sm:$0xff] }
  0x80   : > { %1022 = vmatpush1.bf16.msra.mxu1 %v1021_v2  ;;  %960 = vmatprep.subr.bf16.mxu0 %v959_v3  ;;  %v331_v2 = vld [vmem:[#allocation2 + $0x560] sm:$0xff]  ;;  %v325_v3 = vld [vmem:[#allocation2 + $0x530] sm:$0xff] }
  0x81   : > { %1024 = vmatprep.subr.bf16.mxu1 %v1023_v7  ;;  %v348_v7 = vld [vmem:[#allocation2 + $0x5e8] sm:$0xff]  ;;  %v981_v10 = vpack.c.bf16 %v331_v2, %v323_v1  ;;  %v1045_v11 = vpack.c.bf16 %v333_v5, %v325_v3  ;;  %v405_v1 = vld [vmem:[#allocation2 + $0x7b0] sm:$0xff] }
  0x82   : > { %v983_v12 = vpack.c.bf16 %v348_v7, %v340_v6  ;;  %v413_v2 = vld [vmem:[#allocation2 + $0x7f0] sm:$0xff] }
  0x83   : > { %962 = vmatpush1.bf16.msra.mxu0 %v961_v13  ;;  %v339_v13 = vld [vmem:[#allocation2 + $0x5a0] sm:$0xff] }
  0x84   : > { %1026 = vmatpush1.bf16.msra.mxu1 %v1025_v14  ;;  %964 = vmatprep.subr.bf16.mxu0 %v963_v15  ;;  %v347_v14 = vld [vmem:[#allocation2 + $0x5e0] sm:$0xff]  ;;  %v341_v15 = vld [vmem:[#allocation2 + $0x5b0] sm:$0xff] }
  0x85   : > { %1028 = vmatprep.subr.bf16.mxu1 %v1027_v21  ;;  %v364_v21 = vld [vmem:[#allocation2 + $0x668] sm:$0xff]  ;;  %v985_v24 = vpack.c.bf16 %v347_v14, %v339_v13  ;;  %v1049_v25 = vpack.c.bf16 %v349_v18, %v341_v15 }
  0x86   : > { %v987_v26 = vpack.c.bf16 %v364_v21, %v356_v20 }
  0x87   : > { %966 = vmatpush1.bf16.msra.mxu0 %v965_v27  ;;  %v355_v27 = vld [vmem:[#allocation2 + $0x620] sm:$0xff] }
  0x88   : > { %1030 = vmatpush1.bf16.msra.mxu1 %v1029_v28  ;;  %968 = vmatprep.subr.bf16.mxu0 %v967_v29  ;;  %v363_v28 = vld [vmem:[#allocation2 + $0x660] sm:$0xff]  ;;  %v357_v29 = vld [vmem:[#allocation2 + $0x630] sm:$0xff] }
  0x89   : > { %1032 = vmatprep.subr.bf16.mxu1 %v1031_v33  ;;  %v380_v33 = vld [vmem:[#allocation2 + $0x6e8] sm:$0xff]  ;;  %v989_v36 = vpack.c.bf16 %v363_v28, %v355_v27  ;;  %v1053_v37 = vpack.c.bf16 %v365_v31, %v357_v29 }
  0x8a   : > { %v991_v38 = vpack.c.bf16 %v380_v33, %v372_v32 }
  0x8b   : > { %970 = vmatpush1.bf16.msra.mxu0 %v969_v39  ;;  %v371_v39 = vld [vmem:[#allocation2 + $0x6a0] sm:$0xff] }
  0x8c   : > { %1034 = vmatpush1.bf16.msra.mxu1 %v1033_v40  ;;  %972 = vmatprep.subr.bf16.mxu0 %v971_v41  ;;  %v379_v40 = vld [vmem:[#allocation2 + $0x6e0] sm:$0xff]  ;;  %v373_v41 = vld [vmem:[#allocation2 + $0x6b0] sm:$0xff] }
  0x8d   : > { %1036 = vmatprep.subr.bf16.mxu1 %v1035_v45  ;;  %v396_v45 = vld [vmem:[#allocation2 + $0x768] sm:$0xff]  ;;  %v993_v48 = vpack.c.bf16 %v379_v40, %v371_v39  ;;  %v1057_v49 = vpack.c.bf16 %v381_v43, %v373_v41 }
  0x8e   : > { %v995_v50 = vpack.c.bf16 %v396_v45, %v388_v44 }
  0x8f   : > { %974 = vmatpush1.bf16.msra.mxu0 %v973_v51  ;;  %v387_v51 = vld [vmem:[#allocation2 + $0x720] sm:$0xff] }
  0x90   : > { %1038 = vmatpush1.bf16.msra.mxu1 %v1037_v52  ;;  %976 = vmatprep.subr.bf16.mxu0 %v975_v53  ;;  %v395_v52 = vld [vmem:[#allocation2 + $0x760] sm:$0xff]  ;;  %v389_v53 = vld [vmem:[#allocation2 + $0x730] sm:$0xff] }
  0x91   : > { %1040 = vmatprep.subr.bf16.mxu1 %v1039_v56  ;;  %v412_v56 = vld [vmem:[#allocation2 + $0x7e8] sm:$0xff]  ;;  %v997_v59 = vpack.c.bf16 %v395_v52, %v387_v51  ;;  %v1061_v60 = vpack.c.bf16 %v397_v19, %v389_v53 }
  0x92   : > { %v999_v61 = vpack.c.bf16 %v412_v56, %v404_v55 }
  0x93   : > { %978 = vmatpush1.bf16.msra.mxu0 %v977_v62  ;;  %v403_v62 = vld [vmem:[#allocation2 + $0x7a0] sm:$0xff] }
  0x94   : > { %1042 = vmatpush1.bf16.msra.mxu1 %v1041_v63  ;;  %980 = vmatprep.subr.bf16.mxu0 %v979_v0  ;;  %v411_v63 = vld [vmem:[#allocation2 + $0x7e0] sm:$0xff]  ;;  %v1063_v0 = vpack.c.bf16 %v414_v58, %v406_v57 }
  0x95   : > { %1044 = vmatprep.subr.bf16.mxu1 %v1043_v4  ;;  %v1001_v3 = vpack.c.bf16 %v411_v63, %v403_v62  ;;  %v1065_v4 = vpack.c.bf16 %v413_v2, %v405_v1 }
  0x97   : > { %982 = vmatpush1.bf16.msra.mxu0 %v981_v10 }
  0x98   : > { %1046 = vmatpush1.bf16.msra.mxu1 %v1045_v11  ;;  %984 = vmatprep.subr.bf16.mxu0 %v983_v12 }
  0x99   : > { %1048 = vmatprep.subr.bf16.mxu1 %v1047_v17 }
  0x9b   : > { %986 = vmatpush1.bf16.msra.mxu0 %v985_v24 }
  0x9c   : > { %1050 = vmatpush1.bf16.msra.mxu1 %v1049_v25  ;;  %988 = vmatprep.subr.bf16.mxu0 %v987_v26 }
  0x9d   : > { %1052 = vmatprep.subr.bf16.mxu1 %v1051_v30 }
  0x9f   : > { %990 = vmatpush1.bf16.msra.mxu0 %v989_v36 }
  0xa0   : > { %1054 = vmatpush1.bf16.msra.mxu1 %v1053_v37  ;;  %992 = vmatprep.subr.bf16.mxu0 %v991_v38 }
  0xa1   : > { %1056 = vmatprep.subr.bf16.mxu1 %v1055_v42 }
  0xa3   : > { %994 = vmatpush1.bf16.msra.mxu0 %v993_v48 }
  0xa4   : > { %1058 = vmatpush1.bf16.msra.mxu1 %v1057_v49  ;;  %996 = vmatprep.subr.bf16.mxu0 %v995_v50 }
  0xa5   : > { %1060 = vmatprep.subr.bf16.mxu1 %v1059_v54 }
  0xa7   : > { %998 = vmatpush1.bf16.msra.mxu0 %v997_v59 }
  0xa8   : > { %1062 = vmatpush1.bf16.msra.mxu1 %v1061_v60  ;;  %1000 = vmatprep.subr.bf16.mxu0 %v999_v61 }
  0xa9   : > { %1064 = vmatprep.subr.bf16.mxu1 %v1063_v0 }
  0xab   : > { %1002 = vmatpush1.bf16.msra.mxu0 %v1001_v3 }
  0xac   : > { %1066 = vmatpush1.bf16.msra.mxu1 %v1065_v4 }
  0xae   : > { %626 = vmatmul.mubr.f32.vlgmr.msra.gmra.mrb[2].mxu0 %v1202_v16 }
  0xaf   : > { %697 = vmatmul.mubr.f32.vlgmr.msra.gmra.mrb[2].mxu1 %v1202_v16 }
 0x141   : > { %v485_v5 = vpop.f32.mrb[0].mxu0 }
 0x142   : > { %v556_v6 = vpop.f32.mrb[0].mxu1  ;;  %v487_v7 = vpop.f32.mrb[1].mxu0 }
 0x143   : > { %v705_v8 = vcombine.low %v485_v5, %v487_v7  ;;  %v558_v9 = vpop.f32.mrb[1].mxu1 }
 0x144   : > { %v710_v10 = vcombine.low %v556_v6, %v558_v9 }
 0x145   : > { %707 = vst [vmem:[%s158_s6] sm:$0xff] %v705_v8 }
 0x146   : > { %804 = vst [vmem:[%s158_s6 + $0x8] sm:$0xff] %v710_v10 }
 0x181   : > { %v627_v11 = vpop.f32.mrb[2].mxu0 }
 0x182   : > { %v698_v12 = vpop.f32.mrb[2].mxu1  ;;  %v629_v13 = vpop.f32.mrb[3].mxu0 }
 0x183   : > { %v716_v14 = vcombine.low %v627_v11, %v629_v13  ;;  %v700_v15 = vpop.f32.mrb[3].mxu1 }
 0x184   : > { %v722_v17 = vcombine.low %v698_v12, %v700_v15 }
 0x185   : > { %805 = vst [vmem:[%s158_s6 + $0x10] sm:$0xff] %v716_v14 }
 0x186   : > { %806 = vst [vmem:[%s158_s6 + $0x18] sm:$0xff] %v722_v17 }
 0x187 PF: > { %s13_s9 = sadd.s32 1, %s1127_s9  }
 0x188   : > { %p10_p3 = scmp.ge.s32.totalorder %s13_s9, 4  }
 0x18a   :  { %12 = sbr.rel (!%p10_p3) target bundleno = 1 (0x1), region = 66 }
 0x191   :  { %747 = vsyncpa [#allocation3], 1 }
 0x192   :  { %749 = vsyncpa [#allocation3 + $0x1], 1 }

</bundles_post_ra>
